<compile_context>
chip_gen: v5e
topology: v5e:2x2
jax: 0.10.0
libtpu: 0.0.40
codegen_flags: <defaults>
</compile_context>

<pallas_src>
import numpy as np
import jax
import jax.numpy as jnp
from jax.experimental import pallas as pl
from jax.experimental.pallas import tpu as pltpu


def _round_up(x, m):
    return ((x + m - 1) // m) * m


def _cdiv(a, b):
    return (a + b - 1) // b


def _vmem_capacity_bytes():
    """Per-core VMEM capacity; conservative 64 MiB (v7x) if the query fails."""
    try:
        cap = getattr(pltpu.get_tpu_info(), "vmem_capacity_bytes", None)
        if cap:
            return int(cap)
    except Exception:
        pass
    return 64 * 1024 * 1024


def _padded_bytes(rows, cols, itemsize):
    """Bytes one VMEM block really occupies after (8,128) tile padding."""
    return _round_up(max(rows, 1), 8) * _round_up(max(cols, 1), 128) * itemsize


def _estimate_vmem_bytes(tile, ag):
    """(8,128)-padded working set for one grid step: double-buffered I/O tiles,
    resident weights/biases (counted x2 for the pipeline machinery) and the
    in-kernel f32/bf16 temporaries."""
    weights = 2 * (_padded_bytes(ag, 2 * ag, 2)          # W1 (bf16)
                   + _padded_bytes(2 * ag, 2 * ag, 2)     # W2
                   + _padded_bytes(2 * ag, ag, 2)         # W3
                   + _padded_bytes(ag, ag, 2))            # Wd
    biases = 2 * (2 * _padded_bytes(1, 2 * ag, 4) + _padded_bytes(1, ag, 4))
    io = 4 * _padded_bytes(tile, ag, 4)                   # x in + y out, 2-buffered
    temps = (2 * _padded_bytes(tile, ag, 4)               # x f32, out f32 acc
             + _padded_bytes(tile, ag, 2)                 # x bf16
             + 2 * _padded_bytes(tile, 2 * ag, 4)         # h1, h2 f32
             + 2 * _padded_bytes(tile, 2 * ag, 2))        # h1, h2 bf16 casts
    return weights + biases + io + temps


def _mlp_kernel(x_ref, w1_ref, b1_ref, w2_ref, b2_ref, w3_ref, wd_ref, b3_ref,
                o_ref):
    x = x_ref[...]                                        # (T, Ag) f32
    x_bf = x.astype(jnp.bfloat16)                         # dot operand only

    h = jnp.dot(x_bf, w1_ref[...],
                preferred_element_type=jnp.float32) + b1_ref[...]
    h = jnp.maximum(h, 0.1 * h)                           # LeakyReLU(0.1), f32

    h = jnp.dot(h.astype(jnp.bfloat16), w2_ref[...],
                preferred_element_type=jnp.float32) + b2_ref[...]
    h = jnp.maximum(h, 0.1 * h)

    # Last layer + residual as two accumulated dots (no concat temp).
    out = jnp.dot(h.astype(jnp.bfloat16), w3_ref[...],
                  preferred_element_type=jnp.float32)
    out = out + jnp.dot(x_bf, wd_ref[...], preferred_element_type=jnp.float32)
    o_ref[...] = out + b3_ref[...]


def init_params(key, dim_a):
    """Parameters in PyTorch nn.Linear layout: weight (out, in), bias (out,)."""
    ks = jax.random.split(key, 7)

    def w(k, out_dim, in_dim):
        bound = 1.0 / np.sqrt(in_dim)
        return jax.random.uniform(k, (out_dim, in_dim), jnp.float32, -bound, bound)

    def b(k, out_dim, in_dim):
        bound = 1.0 / np.sqrt(in_dim)
        return jax.random.uniform(k, (out_dim,), jnp.float32, -bound, bound)

    return {
        "w_direct": w(ks[0], dim_a, dim_a),               # bias-free
        "w1": w(ks[1], 2 * dim_a, dim_a), "b1": b(ks[2], 2 * dim_a, dim_a),
        "w2": w(ks[3], 2 * dim_a, 2 * dim_a), "b2": b(ks[4], 2 * dim_a, 2 * dim_a),
        "w3": w(ks[5], dim_a, 2 * dim_a), "b3": b(ks[6], dim_a, 2 * dim_a),
    }


def mlp_forward(x, params):
    rest = x.shape[:-1]
    dim_a = x.shape[-1]
    n = int(np.prod(rest)) if rest else 1

    # ---- row grouping: lane-dense layout for small feature dims ------------
    g_max = 1 if dim_a >= 128 else _cdiv(128, dim_a)
    group = 1
    for g in range(g_max, 0, -1):       # largest group factor dividing n
        if n % g == 0:
            group = g
            break
    ag = group * dim_a                  # lane width of one grouped row
    n_g = n // group
    x_g = x.reshape(n_g, ag)            # row-major view, no data movement

    # ---- weights: right-multiply layout, block-diagonal grouped, bf16 ------
    eye = jnp.eye(group, dtype=jnp.float32)

    def pack_w(wt):                     # (out, in) torch layout -> (G*in, G*out)
        return jnp.kron(eye, wt.T).astype(jnp.bfloat16)

    def pack_b(bias):                   # (out,) -> (1, G*out), stays f32
        return jnp.tile(bias, group).reshape(1, group * bias.shape[0])

    w1 = pack_w(params["w1"]); b1 = pack_b(params["b1"])
    w2 = pack_w(params["w2"]); b2 = pack_b(params["b2"])
    w3 = pack_w(params["w3"]); b3 = pack_b(params["b3"])
    wd = pack_w(params["w_direct"])

    # ---- batch tile from the per-chip VMEM budget ---------------------------
    vmem_cap = _vmem_capacity_bytes()                   # 128 MiB v5e/v6e, 64 MiB v7x
    budget = min(int(vmem_cap * 0.45), 56 * 1024 * 1024)
    tile = 8
    for cand in (8192, 4096, 2048, 1024, 512, 256, 128, 64, 32, 16, 8):
        if _estimate_vmem_bytes(cand, ag) <= budget:
            tile = cand
            break
    # v7x has 2 TensorCores: keep the grid at >= 2 steps when the batch allows.
    half = _round_up(_cdiv(n_g, 2), 8)
    tile = min(tile, half)
    if tile >= n_g or tile < 8:
        tile = n_g                                      # single full-extent block
    grid = (_cdiv(n_g, tile),)                          # ragged tail is masked

    est = _estimate_vmem_bytes(tile, ag)
    vmem_limit = min(max(int(est * 1.5) + (2 << 20), 32 << 20),
                     int(vmem_cap * 0.9))

    def const(shape):                                   # resident, DMA'd once
        return pl.BlockSpec(shape, lambda i: (0, 0))

    out = pl.pallas_call(
        _mlp_kernel,
        grid=grid,
        in_specs=(
            pl.BlockSpec((tile, ag), lambda i: (i, 0)),   # x tile
            const((ag, 2 * ag)), const((1, 2 * ag)),      # W1, b1
            const((2 * ag, 2 * ag)), const((1, 2 * ag)),  # W2, b2
            const((2 * ag, ag)),                          # W3
            const((ag, ag)),                              # Wd (residual)
            const((1, ag)),                               # b3
        ),
        out_specs=pl.BlockSpec((tile, ag), lambda i: (i, 0)),
        out_shape=jax.ShapeDtypeStruct((n_g, ag), jnp.float32),
        compiler_params=pltpu.CompilerParams(
            dimension_semantics=("parallel",),
            vmem_limit_bytes=vmem_limit,
        ),
    )(x_g, w1, b1, w2, b2, w3, wd, b3)

    return out.reshape(*rest, dim_a)


def reference(x, params):
    """Pure-JAX forward with the exact PyTorch MLP semantics (f32)."""
    h = x @ params["w1"].T + params["b1"]
    h = jnp.where(h > 0, h, 0.1 * h)
    h = h @ params["w2"].T + params["b2"]
    h = jnp.where(h > 0, h, 0.1 * h)
    h = h @ params["w3"].T + params["b3"]
    return x @ params["w_direct"].T + h


if __name__ == "__main__":
    key = jax.random.PRNGKey(0)
    B, S, dim_a = 2, 8, 32

    kx, kp = jax.random.split(key)
    x = jax.random.normal(kx, (B, S, dim_a), jnp.float32)
    params = init_params(kp, dim_a)

    y = jax.jit(mlp_forward)(x, params)
    jax.block_until_ready(y)

    r = reference(x, params)
    # bf16 MXU operands (weights stored bf16, f32 accumulation) -> ~1e-2 level.
    np.testing.assert_allclose(np.asarray(y), np.asarray(r), rtol=2e-2, atol=2e-2)

    print("KERNEL_OK")
</pallas_src>

<mosaic_0001>
module attributes {stable_mosaic.version = 11 : i64} {
  func.func @_mlp_kernel(%arg0: i32, %arg1: memref<4x128xf32, #tpu.memory_space<vmem>>, %arg2: memref<128x256xbf16, #tpu.memory_space<vmem>>, %arg3: memref<1x256xf32, #tpu.memory_space<vmem>>, %arg4: memref<256x256xbf16, #tpu.memory_space<vmem>>, %arg5: memref<1x256xf32, #tpu.memory_space<vmem>>, %arg6: memref<256x128xbf16, #tpu.memory_space<vmem>>, %arg7: memref<128x128xbf16, #tpu.memory_space<vmem>>, %arg8: memref<1x128xf32, #tpu.memory_space<vmem>>, %arg9: memref<4x128xf32, #tpu.memory_space<vmem>>) attributes {dimension_semantics = [#tpu.dimension_semantics<parallel>], iteration_bounds = array<i64: 1>, scalar_prefetch = 0 : i64, scratch_operands = 0 : i64, tpu.core_type = #tpu.core_type<tc>, window_params = [{transform_indices = @transform_0, window_bounds = array<i64: 4, 128>}, {pipeline_mode = #tpu.pipeline_mode<synchronous>, transform_indices = @transform_1, window_bounds = array<i64: 128, 256>}, {pipeline_mode = #tpu.pipeline_mode<synchronous>, transform_indices = @transform_2, window_bounds = array<i64: 1, 256>}, {pipeline_mode = #tpu.pipeline_mode<synchronous>, transform_indices = @transform_3, window_bounds = array<i64: 256, 256>}, {pipeline_mode = #tpu.pipeline_mode<synchronous>, transform_indices = @transform_4, window_bounds = array<i64: 1, 256>}, {pipeline_mode = #tpu.pipeline_mode<synchronous>, transform_indices = @transform_5, window_bounds = array<i64: 256, 128>}, {pipeline_mode = #tpu.pipeline_mode<synchronous>, transform_indices = @transform_6, window_bounds = array<i64: 128, 128>}, {pipeline_mode = #tpu.pipeline_mode<synchronous>, transform_indices = @transform_7, window_bounds = array<i64: 1, 128>}, {transform_indices = @transform_8, window_bounds = array<i64: 4, 128>}]} {
    %c0 = arith.constant 0 : index
    %c0_0 = arith.constant 0 : index
    %0 = vector.load %arg1[%c0, %c0_0] : memref<4x128xf32, #tpu.memory_space<vmem>>, vector<4x128xf32>
    %1 = arith.truncf %0 : vector<4x128xf32> to vector<4x128xbf16>
    %c0_1 = arith.constant 0 : index
    %c0_2 = arith.constant 0 : index
    %2 = vector.load %arg2[%c0_1, %c0_2] : memref<128x256xbf16, #tpu.memory_space<vmem>>, vector<128x256xbf16>
    %cst = arith.constant dense<0.000000e+00> : vector<4x256xf32>
    %3 = tpu.matmul %1, %2, %cst {dimension_numbers = #tpu.dot_dimension_numbers<[1], [0], [0], [1], [0, 0, 1, 1], [], []>} : vector<4x128xbf16>, vector<128x256xbf16>, vector<4x256xf32> -> vector<4x256xf32>
    %c0_3 = arith.constant 0 : index
    %c0_4 = arith.constant 0 : index
    %4 = vector.load %arg3[%c0_3, %c0_4] : memref<1x256xf32, #tpu.memory_space<vmem>>, vector<1x256xf32>
    %5 = vector.broadcast %4 : vector<1x256xf32> to vector<4x256xf32>
    %6 = arith.addf %3, %5 : vector<4x256xf32>
    %cst_5 = arith.constant 1.000000e-01 : f32
    %7 = vector.broadcast %cst_5 : f32 to vector<4x256xf32>
    %8 = arith.mulf %7, %6 : vector<4x256xf32>
    %9 = arith.maximumf %6, %8 : vector<4x256xf32>
    %10 = arith.truncf %9 : vector<4x256xf32> to vector<4x256xbf16>
    %c0_6 = arith.constant 0 : index
    %c0_7 = arith.constant 0 : index
    %11 = vector.load %arg4[%c0_6, %c0_7] : memref<256x256xbf16, #tpu.memory_space<vmem>>, vector<256x256xbf16>
    %cst_8 = arith.constant dense<0.000000e+00> : vector<4x256xf32>
    %12 = tpu.matmul %10, %11, %cst_8 {dimension_numbers = #tpu.dot_dimension_numbers<[1], [0], [0], [1], [0, 0, 1, 1], [], []>} : vector<4x256xbf16>, vector<256x256xbf16>, vector<4x256xf32> -> vector<4x256xf32>
    %c0_9 = arith.constant 0 : index
    %c0_10 = arith.constant 0 : index
    %13 = vector.load %arg5[%c0_9, %c0_10] : memref<1x256xf32, #tpu.memory_space<vmem>>, vector<1x256xf32>
    %14 = vector.broadcast %13 : vector<1x256xf32> to vector<4x256xf32>
    %15 = arith.addf %12, %14 : vector<4x256xf32>
    %cst_11 = arith.constant 1.000000e-01 : f32
    %16 = vector.broadcast %cst_11 : f32 to vector<4x256xf32>
    %17 = arith.mulf %16, %15 : vector<4x256xf32>
    %18 = arith.maximumf %15, %17 : vector<4x256xf32>
    %19 = arith.truncf %18 : vector<4x256xf32> to vector<4x256xbf16>
    %c0_12 = arith.constant 0 : index
    %c0_13 = arith.constant 0 : index
    %20 = vector.load %arg6[%c0_12, %c0_13] : memref<256x128xbf16, #tpu.memory_space<vmem>>, vector<256x128xbf16>
    %cst_14 = arith.constant dense<0.000000e+00> : vector<4x128xf32>
    %21 = tpu.matmul %19, %20, %cst_14 {dimension_numbers = #tpu.dot_dimension_numbers<[1], [0], [0], [1], [0, 0, 1, 1], [], []>} : vector<4x256xbf16>, vector<256x128xbf16>, vector<4x128xf32> -> vector<4x128xf32>
    %c0_15 = arith.constant 0 : index
    %c0_16 = arith.constant 0 : index
    %22 = vector.load %arg7[%c0_15, %c0_16] : memref<128x128xbf16, #tpu.memory_space<vmem>>, vector<128x128xbf16>
    %cst_17 = arith.constant dense<0.000000e+00> : vector<4x128xf32>
    %23 = tpu.matmul %1, %22, %cst_17 {dimension_numbers = #tpu.dot_dimension_numbers<[1], [0], [0], [1], [0, 0, 1, 1], [], []>} : vector<4x128xbf16>, vector<128x128xbf16>, vector<4x128xf32> -> vector<4x128xf32>
    %24 = arith.addf %21, %23 : vector<4x128xf32>
    %c0_18 = arith.constant 0 : index
    %c0_19 = arith.constant 0 : index
    %25 = vector.load %arg8[%c0_18, %c0_19] : memref<1x128xf32, #tpu.memory_space<vmem>>, vector<1x128xf32>
    %26 = vector.broadcast %25 : vector<1x128xf32> to vector<4x128xf32>
    %27 = arith.addf %24, %26 : vector<4x128xf32>
    %c0_20 = arith.constant 0 : index
    %c0_21 = arith.constant 0 : index
    %28 = vector.load %arg9[%c0_20, %c0_21] : memref<4x128xf32, #tpu.memory_space<vmem>>, vector<4x128xf32>
    tpu.vector_store %arg9[%c0_20, %c0_21], %27 {strides = array<i32>} : memref<4x128xf32, #tpu.memory_space<vmem>>, vector<4x128xf32>,
    return
  }
  func.func @transform_0(%arg0: i32) -> (i32, i32) {
    %c0_i32 = arith.constant 0 : i32
    %c0_i32_0 = arith.constant 0 : i32
    return %arg0, %c0_i32 : i32, i32
  }
  func.func @transform_1(%arg0: i32) -> (i32, i32) {
    %c0_i32 = arith.constant 0 : i32
    %c0_i32_0 = arith.constant 0 : i32
    %c0_i32_1 = arith.constant 0 : i32
    return %c0_i32, %c0_i32_0 : i32, i32
  }
  func.func @transform_2(%arg0: i32) -> (i32, i32) {
    %c0_i32 = arith.constant 0 : i32
    %c0_i32_0 = arith.constant 0 : i32
    %c0_i32_1 = arith.constant 0 : i32
    return %c0_i32, %c0_i32_0 : i32, i32
  }
  func.func @transform_3(%arg0: i32) -> (i32, i32) {
    %c0_i32 = arith.constant 0 : i32
    %c0_i32_0 = arith.constant 0 : i32
    %c0_i32_1 = arith.constant 0 : i32
    return %c0_i32, %c0_i32_0 : i32, i32
  }
  func.func @transform_4(%arg0: i32) -> (i32, i32) {
    %c0_i32 = arith.constant 0 : i32
    %c0_i32_0 = arith.constant 0 : i32
    %c0_i32_1 = arith.constant 0 : i32
    return %c0_i32, %c0_i32_0 : i32, i32
  }
  func.func @transform_5(%arg0: i32) -> (i32, i32) {
    %c0_i32 = arith.constant 0 : i32
    %c0_i32_0 = arith.constant 0 : i32
    %c0_i32_1 = arith.constant 0 : i32
    return %c0_i32, %c0_i32_0 : i32, i32
  }
  func.func @transform_6(%arg0: i32) -> (i32, i32) {
    %c0_i32 = arith.constant 0 : i32
    %c0_i32_0 = arith.constant 0 : i32
    %c0_i32_1 = arith.constant 0 : i32
    return %c0_i32, %c0_i32_0 : i32, i32
  }
  func.func @transform_7(%arg0: i32) -> (i32, i32) {
    %c0_i32 = arith.constant 0 : i32
    %c0_i32_0 = arith.constant 0 : i32
    %c0_i32_1 = arith.constant 0 : i32
    return %c0_i32, %c0_i32_0 : i32, i32
  }
  func.func @transform_8(%arg0: i32) -> (i32, i32) {
    %c0_i32 = arith.constant 0 : i32
    %c0_i32_0 = arith.constant 0 : i32
    return %arg0, %c0_i32 : i32, i32
  }
}

</mosaic_0001>

<bundles_post_ra>
// kernel: tile.18
= control target key start
LH: loop header
LB: loop body
LE: loop exit
PB: predicated region body
PF: predicated region fallthrough
CT: control target
= control target key end

     0   :  { %s22_s0 = inlined_call_operand.vmem [shape: f32[64], index: 0, kind: input, shape index: {}]   ;;  %s23_s1 = inlined_call_operand.vmem [shape: f32[4,64], index: 1, kind: output, shape index: {}]  }
   0x1   :  { %v4_v0 = vld [vmem:[%s22_s0] ss:$0 sm:$0xff] }
   0x2   :  { %5 = vst [vmem:[%s23_s1] sm:$0xf] %v4_v0 }

// kernel: tile.19
= control target key start
LH: loop header
LB: loop body
LE: loop exit
PB: predicated region body
PF: predicated region fallthrough
CT: control target
= control target key end

     0   :  { %s6_s8 = smov 3  ;;  %vm8_vm0 = vcmask 523264   ;;  %s31_s9 = smov 64   ;;  %vm15_vm1 = vcmask 1048064   ;;  %s51_s0 = inlined_call_operand.vmem [shape: f32[4,64], index: 0, kind: input, shape index: {}]   ;;  %s52_s1 = inlined_call_operand.vmem [shape: f32[1,256], index: 1, kind: output, shape index: {}]  }
   0x1   :  { %v4_v0 = vld [vmem:[%s51_s0] sm:$0xf]  ;;  %s11_s0 = smov 3 }
   0x2   :  { %5 = vst [vmem:[#allocation1] sm:$0xf] %v4_v0 }
   0x9   :  { %v12_v1 = vld [vmem:[#allocation1 + $0x1] ss:$2 sm:%s11_s0]   ;;  %v7_v2 = vld [vmem:[#allocation1] ss:$2 sm:%s6_s8]  }
   0xa   :  { %13 = vrot.lane.b32.xlu0 %v12_v1, %s31_s9  ;;  %9 = vst.msk [vmem:[#allocation0] ss:$8 sm:$0x3] %vm8_vm0, %v7_v2  }
  0x7c   :  { %v14_v3 = vpop.permute.xlu0 %13  }
  0x7d   :  { %16 = vst.msk [vmem:[#allocation0] ss:$8 sm:$0x3] %vm15_vm1, %v14_v3  }
  0x84   :  { %v19_v4 = vld [vmem:[#allocation0] sm:$0x1]  ;;  %v24_v5 = vld [vmem:[#allocation0 + $0x8] sm:$0x1] }
  0x85   :  { %22 = vst [vmem:[%s52_s1] sm:$0x1] %v19_v4 }
  0x86   :  { %29 = vst [vmem:[%s52_s1 + $0x1] sm:$0x1] %v24_v5 }

// kernel: tile.28
= control target key start
LH: loop header
LB: loop body
LE: loop exit
PB: predicated region body
PF: predicated region fallthrough
CT: control target
= control target key end

     0   :  { %s22_s0 = inlined_call_operand.vmem [shape: f32[32], index: 0, kind: input, shape index: {}]   ;;  %s23_s1 = inlined_call_operand.vmem [shape: f32[4,32], index: 1, kind: output, shape index: {}]  }
   0x1   :  { %v4_v0 = vld [vmem:[%s22_s0] ss:$0 sm:$0xff] }
   0x2   :  { %5 = vst [vmem:[%s23_s1] sm:$0xf] %v4_v0 }

// kernel: tile.29
= control target key start
LH: loop header
LB: loop body
LE: loop exit
PB: predicated region body
PF: predicated region fallthrough
CT: control target
= control target key end

     0   :  { %s37_s8 = smov 32   ;;  %s38_s9 = smov 64   ;;  %vm7_vm0 = vcmask 261120   ;;  %vm13_vm1 = vcmask 1048320   ;;  %vm19_vm2 = vcmask 785920   ;;  %vm25_vm3 = vcmask 523520   ;;  %s55_s0 = inlined_call_operand.vmem [shape: f32[4,32], index: 0, kind: input, shape index: {}]   ;;  %s56_s1 = inlined_call_operand.vmem [shape: f32[1,128], index: 1, kind: output, shape index: {}]  }
   0x1   :  { %v4_v0 = vld [vmem:[%s55_s0] sm:$0xf]  ;;  %s36_s0 = smov 96  }
   0x2   :  { %5 = vst [vmem:[#allocation1] sm:$0xf] %v4_v0 }
   0x9   :  { %v10_v1 = vld [vmem:[#allocation1 + $0x3] sm:$0x1]   ;;  %v22_v2 = vld [vmem:[#allocation1 + $0x1] sm:$0x1]   ;;  %v16_v3 = vld [vmem:[#allocation1 + $0x2] sm:$0x1]  }
   0xa   :  { %11 = vrot.lane.b32.xlu0 %v10_v1, %s36_s0  ;;  %23 = vrot.lane.b32.xlu1 %v22_v2, %s37_s8  ;;  %v6_v4 = vld [vmem:[#allocation1] sm:$0x1]  }
   0xb   :  { %8 = vst.msk [vmem:[#allocation0] sm:$0x1] %vm7_vm0, %v6_v4  }
  0x12   :  { %17 = vrot.lane.b32.xlu0 %v16_v3, %s38_s9 }
  0x7c   :  { %v12_v5 = vpop.permute.xlu0 %11   ;;  %v24_v6 = vpop.permute.xlu1 %23  }
  0x7d   :  { %14 = vst.msk [vmem:[#allocation0] sm:$0x1] %vm13_vm1, %v12_v5  }
  0x84   :  { %v18_v7 = vpop.permute.xlu0 %17  }
  0x85   :  { %20 = vst.msk [vmem:[#allocation0] sm:$0x1] %vm19_vm2, %v18_v7  }
  0x86   :  { %26 = vst.msk [vmem:[#allocation0] sm:$0x1] %vm25_vm3, %v24_v6  }
  0x8d   :  { %v29_v8 = vld [vmem:[#allocation0] sm:$0x1] }
  0x8e   :  { %32 = vst [vmem:[%s56_s1] sm:$0x1] %v29_v8 }

// kernel: mlp_forward.1
= control target key start
LH: loop header
LB: loop body
LE: loop exit
PB: predicated region body
PF: predicated region fallthrough
CT: control target
= control target key end

     0   :  { %s1448_s1 = inlined_call_operand.vmem [shape: bf16[128,256], index: 1, kind: input, shape index: {}]   ;;  %s1449_s3 = inlined_call_operand.vmem [shape: bf16[256,256], index: 3, kind: input, shape index: {}]   ;;  %s1450_s0 = inlined_call_operand.vmem [shape: f32[4,128], index: 0, kind: input, shape index: {}]   ;;  %s1451_s6 = inlined_call_operand.vmem [shape: bf16[128,128], index: 6, kind: input, shape index: {}]   ;;  %s1452_s5 = inlined_call_operand.vmem [shape: bf16[256,128], index: 5, kind: input, shape index: {}]   ;;  %s1453_s2 = inlined_call_operand.vmem [shape: f32[1,256], index: 2, kind: input, shape index: {}]   ;;  %s1454_s4 = inlined_call_operand.vmem [shape: f32[1,256], index: 4, kind: input, shape index: {}]   ;;  %s1455_s7 = inlined_call_operand.vmem [shape: f32[1,128], index: 7, kind: input, shape index: {}]   ;;  %s1456_s8 = inlined_call_operand.vmem [shape: f32[4,128], index: 8, kind: output, shape index: {}]  }
   0x1   :  { %v720_v0 = vld [vmem:[%s1448_s1 + $0x70] sm:$0xf]  ;;  %v965_v1 = vld [vmem:[%s1448_s1 + $0x74] sm:$0xf0]  ;;  %v964_v2 = vld [vmem:[%s1448_s1 + $0x74] sm:$0xf] }
   0x2   :  { %v721_v3 = vor.u32 %v965_v1, %v720_v0  ;;  %v722_v4 = vld [vmem:[%s1448_s1 + $0x78] sm:$0xf0]  ;;  %v712_v5 = vld [vmem:[%s1448_s1 + $0x60] sm:$0xf]  ;;  %v963_v6 = vld [vmem:[%s1448_s1 + $0x64] sm:$0xf0] }
   0x3   :  { %v725_v7 = vor.u32 %v964_v2, %v722_v4  ;;  %v962_v8 = vld [vmem:[%s1448_s1 + $0x64] sm:$0xf]  ;;  %v714_v9 = vld [vmem:[%s1448_s1 + $0x68] sm:$0xf0]  ;;  %v713_v10 = vor.u32 %v963_v6, %v712_v5  ;;  %v704_v12 = vld [vmem:[%s1448_s1 + $0x50] sm:$0xf] }
   0x4   :  { %133 = vmatpush.bf16.msra.mxu0 %v721_v3  ;;  %v717_v11 = vor.u32 %v962_v8, %v714_v9  ;;  %v961_v13 = vld [vmem:[%s1448_s1 + $0x54] sm:$0xf0]  ;;  %v960_v14 = vld [vmem:[%s1448_s1 + $0x54] sm:$0xf]  ;;  %v706_v15 = vld [vmem:[%s1448_s1 + $0x58] sm:$0xf0] }
   0x5   :  { %146 = vmatpush.bf16.msra.mxu1 %v725_v7  ;;  %v705_v16 = vor.u32 %v961_v13, %v704_v12  ;;  %v709_v17 = vor.u32 %v960_v14, %v706_v15  ;;  %v696_v18 = vld [vmem:[%s1448_s1 + $0x40] sm:$0xf]  ;;  %v959_v19 = vld [vmem:[%s1448_s1 + $0x44] sm:$0xf0]  ;;  %v958_v20 = vld [vmem:[%s1448_s1 + $0x44] sm:$0xf] }
   0x6   :  { %v698_v21 = vld [vmem:[%s1448_s1 + $0x48] sm:$0xf0]  ;;  %v697_v22 = vor.u32 %v959_v19, %v696_v18  ;;  %v784_v23 = vld [vmem:[%s1449_s3 + $0x70] sm:$0xf]  ;;  %v981_v24 = vld [vmem:[%s1449_s3 + $0x74] sm:$0xf0] }
   0x7   :  { %v848_v25 = vld [vmem:[%s1449_s3 + $0xf0] sm:$0xf]  ;;  %v701_v26 = vor.u32 %v958_v20, %v698_v21  ;;  %v957_v28 = vld [vmem:[%s1448_s1 + $0x34] sm:$0xf0]  ;;  %v785_v29 = vor.u32 %v981_v24, %v784_v23  ;;  %v956_v31 = vld [vmem:[%s1448_s1 + $0x34] sm:$0xf] }
   0x8   :  { %134 = vmatpush.bf16.msra.mxu0 %v713_v10  ;;  %v688_v27 = vld [vmem:[%s1448_s1 + $0x30] sm:$0xf]  ;;  %v997_v30 = vld [vmem:[%s1449_s3 + $0xf4] sm:$0xf0]  ;;  %v690_v32 = vld [vmem:[%s1448_s1 + $0x38] sm:$0xf0] }
   0x9   :  { %147 = vmatpush.bf16.msra.mxu1 %v717_v11  ;;  %v849_v33 = vor.u32 %v997_v30, %v848_v25  ;;  %v776_v34 = vld [vmem:[%s1449_s3 + $0x60] sm:$0xf]  ;;  %363 = vmatpush.bf16.msra.mxu2 %v785_v29  ;;  %v979_v35 = vld [vmem:[%s1449_s3 + $0x64] sm:$0xf0]  ;;  %v689_v38 = vor.u32 %v957_v28, %v688_v27  ;;  %v693_v43 = vor.u32 %v956_v31, %v690_v32  ;;  %v954_v44 = vld [vmem:[%s1448_s1 + $0x24] sm:$0xf] }
   0xa   :  { %v840_v36 = vld [vmem:[%s1449_s3 + $0xe0] sm:$0xf]  ;;  %v995_v37 = vld [vmem:[%s1449_s3 + $0xe4] sm:$0xf0]  ;;  %v777_v41 = vor.u32 %v979_v35, %v776_v34  ;;  %v768_v45 = vld [vmem:[%s1449_s3 + $0x50] sm:$0xf] }
   0xb   :  { %v680_v39 = vld [vmem:[%s1448_s1 + $0x20] sm:$0xf]  ;;  %v955_v40 = vld [vmem:[%s1448_s1 + $0x24] sm:$0xf0]  ;;  %376 = vmatpush.bf16.msra.mxu3 %v849_v33  ;;  %v841_v42 = vor.u32 %v995_v37, %v840_v36  ;;  %v977_v46 = vld [vmem:[%s1449_s3 + $0x54] sm:$0xf0] }
   0xc   :  { %135 = vmatpush.bf16.msra.mxu0 %v705_v16  ;;  %v682_v47 = vld [vmem:[%s1448_s1 + $0x28] sm:$0xf0]  ;;  %v832_v48 = vld [vmem:[%s1449_s3 + $0xd0] sm:$0xf]  ;;  %v993_v49 = vld [vmem:[%s1449_s3 + $0xd4] sm:$0xf0]  ;;  %v769_v50 = vor.u32 %v977_v46, %v768_v45  ;;  %v681_v51 = vor.u32 %v955_v40, %v680_v39 }
   0xd   :  { %148 = vmatpush.bf16.msra.mxu1 %v709_v17  ;;  %364 = vmatpush.bf16.msra.mxu2 %v777_v41  ;;  %v672_v52 = vld [vmem:[%s1448_s1 + $0x10] sm:$0xf]  ;;  %v833_v53 = vor.u32 %v993_v49, %v832_v48  ;;  %v760_v54 = vld [vmem:[%s1449_s3 + $0x40] sm:$0xf]  ;;  %v975_v55 = vld [vmem:[%s1449_s3 + $0x44] sm:$0xf0]  ;;  %v685_v56 = vor.u32 %v954_v44, %v682_v47 }
   0xe   :  { %v953_v57 = vld [vmem:[%s1448_s1 + $0x14] sm:$0xf0]  ;;  %v824_v58 = vld [vmem:[%s1449_s3 + $0xc0] sm:$0xf]  ;;  %v991_v59 = vld [vmem:[%s1449_s3 + $0xc4] sm:$0xf0]  ;;  %v761_v63 = vor.u32 %v975_v55, %v760_v54 }
   0xf   :  { %377 = vmatpush.bf16.msra.mxu3 %v841_v42  ;;  %v952_v60 = vld [vmem:[%s1448_s1 + $0x14] sm:$0xf]  ;;  %v674_v61 = vld [vmem:[%s1448_s1 + $0x18] sm:$0xf0]  ;;  %v664_v62 = vld [vmem:[%s1448_s1] sm:$0xf]  ;;  %v673_v0 = vor.u32 %v953_v57, %v672_v52  ;;  %v825_v2 = vor.u32 %v991_v59, %v824_v58 }
  0x10   :  { %136 = vmatpush.bf16.msra.mxu0 %v697_v22  ;;  %v951_v1 = vld [vmem:[%s1448_s1 + $0x4] sm:$0xf0]  ;;  %v752_v3 = vld [vmem:[%s1449_s3 + $0x30] sm:$0xf]  ;;  %v973_v4 = vld [vmem:[%s1449_s3 + $0x34] sm:$0xf0]  ;;  %v677_v5 = vor.u32 %v952_v60, %v674_v61 }
  0x11   :  { %149 = vmatpush.bf16.msra.mxu1 %v701_v26  ;;  %365 = vmatpush.bf16.msra.mxu2 %v769_v50  ;;  %v950_v6 = vld [vmem:[%s1448_s1 + $0x4] sm:$0xf]  ;;  %v816_v7 = vld [vmem:[%s1449_s3 + $0xb0] sm:$0xf]  ;;  %v989_v8 = vld [vmem:[%s1449_s3 + $0xb4] sm:$0xf0]  ;;  %v753_v14 = vor.u32 %v973_v4, %v752_v3  ;;  %v665_v15 = vor.u32 %v951_v1, %v664_v62 }
  0x12   :  { %v666_v9 = vld [vmem:[%s1448_s1 + $0x8] sm:$0xf0]  ;;  %v980_v10 = vld [vmem:[%s1449_s3 + $0x74] sm:$0xf]  ;;  %v786_v11 = vld [vmem:[%s1449_s3 + $0x78] sm:$0xf0]  ;;  %v817_v17 = vor.u32 %v989_v8, %v816_v7 }
  0x13   :  { %378 = vmatpush.bf16.msra.mxu3 %v833_v53  ;;  %v996_v12 = vld [vmem:[%s1449_s3 + $0xf4] sm:$0xf]  ;;  %v850_v13 = vld [vmem:[%s1449_s3 + $0xf8] sm:$0xf0]  ;;  %v29_v16 = vld [vmem:[%s1450_s0] sm:$0xf]  ;;  %v669_v20 = vor.u32 %v950_v6, %v666_v9  ;;  %v789_v21 = vor.u32 %v980_v10, %v786_v11 }
  0x14   :  { %137 = vmatpush.bf16.msra.mxu0 %v689_v38  ;;  %v744_v18 = vld [vmem:[%s1449_s3 + $0x20] sm:$0xf]  ;;  %v971_v19 = vld [vmem:[%s1449_s3 + $0x24] sm:$0xf0]  ;;  %v853_v24 = vor.u32 %v996_v12, %v850_v13  ;;  %v978_v25 = vld [vmem:[%s1449_s3 + $0x64] sm:$0xf]  ;;  %v1257_v27 = vpack.c.bf16 %v29_v16, %v29_v16 }
  0x15   :  { %150 = vmatpush.bf16.msra.mxu1 %v693_v43  ;;  %366 = vmatpush.bf16.msra.mxu2 %v761_v63  ;;  %v808_v22 = vld [vmem:[%s1449_s3 + $0xa0] sm:$0xf]  ;;  %v987_v23 = vld [vmem:[%s1449_s3 + $0xa4] sm:$0xf0]  ;;  %v778_v26 = vld [vmem:[%s1449_s3 + $0x68] sm:$0xf0]  ;;  %v745_v30 = vor.u32 %v971_v19, %v744_v18 }
  0x16   :  { %v994_v28 = vld [vmem:[%s1449_s3 + $0xe4] sm:$0xf]  ;;  %v842_v29 = vld [vmem:[%s1449_s3 + $0xe8] sm:$0xf0]  ;;  %v809_v31 = vor.u32 %v987_v23, %v808_v22  ;;  %v781_v32 = vor.u32 %v978_v25, %v778_v26  ;;  %v976_v34 = vld [vmem:[%s1449_s3 + $0x54] sm:$0xf] }
  0x17   :  { %379 = vmatpush.bf16.msra.mxu3 %v825_v2  ;;  %v845_v33 = vor.u32 %v994_v28, %v842_v29  ;;  %v770_v35 = vld [vmem:[%s1449_s3 + $0x58] sm:$0xf0]  ;;  %v992_v36 = vld [vmem:[%s1449_s3 + $0xd4] sm:$0xf]  ;;  %v974_v40 = vld [vmem:[%s1449_s3 + $0x44] sm:$0xf] }
  0x18   :  { %138 = vmatpush.bf16.msra.mxu0 %v681_v51  ;;  %v834_v37 = vld [vmem:[%s1449_s3 + $0xd8] sm:$0xf0]  ;;  %v773_v38 = vor.u32 %v976_v34, %v770_v35  ;;  %v762_v41 = vld [vmem:[%s1449_s3 + $0x48] sm:$0xf0]  ;;  %v990_v42 = vld [vmem:[%s1449_s3 + $0xc4] sm:$0xf] }
  0x19   :  { %151 = vmatpush.bf16.msra.mxu1 %v685_v56  ;;  %367 = vmatpush.bf16.msra.mxu2 %v753_v14  ;;  %v837_v39 = vor.u32 %v992_v36, %v834_v37  ;;  %v826_v43 = vld [vmem:[%s1449_s3 + $0xc8] sm:$0xf0]  ;;  %v765_v44 = vor.u32 %v974_v40, %v762_v41  ;;  %v972_v46 = vld [vmem:[%s1449_s3 + $0x34] sm:$0xf]  ;;  %v754_v47 = vld [vmem:[%s1449_s3 + $0x38] sm:$0xf0] }
  0x1a   :  { %v829_v45 = vor.u32 %v990_v42, %v826_v43  ;;  %v988_v48 = vld [vmem:[%s1449_s3 + $0xb4] sm:$0xf]  ;;  %v818_v49 = vld [vmem:[%s1449_s3 + $0xb8] sm:$0xf0]  ;;  %v757_v50 = vor.u32 %v972_v46, %v754_v47  ;;  %v970_v52 = vld [vmem:[%s1449_s3 + $0x24] sm:$0xf] }
  0x1b   :  { %380 = vmatpush.bf16.msra.mxu3 %v817_v17  ;;  %v821_v51 = vor.u32 %v988_v48, %v818_v49  ;;  %v746_v53 = vld [vmem:[%s1449_s3 + $0x28] sm:$0xf0]  ;;  %v986_v54 = vld [vmem:[%s1449_s3 + $0xa4] sm:$0xf]  ;;  %v736_v58 = vld [vmem:[%s1449_s3 + $0x10] sm:$0xf] }
  0x1c   :  { %139 = vmatpush.bf16.msra.mxu0 %v673_v0  ;;  %v810_v55 = vld [vmem:[%s1449_s3 + $0xa8] sm:$0xf0]  ;;  %v749_v56 = vor.u32 %v970_v52, %v746_v53  ;;  %v969_v59 = vld [vmem:[%s1449_s3 + $0x14] sm:$0xf0]  ;;  %v800_v61 = vld [vmem:[%s1449_s3 + $0x90] sm:$0xf] }
  0x1d   :  { %152 = vmatpush.bf16.msra.mxu1 %v677_v5  ;;  %368 = vmatpush.bf16.msra.mxu2 %v745_v30  ;;  %v813_v57 = vor.u32 %v986_v54, %v810_v55  ;;  %v737_v60 = vor.u32 %v969_v59, %v736_v58  ;;  %v985_v62 = vld [vmem:[%s1449_s3 + $0x94] sm:$0xf0]  ;;  %v968_v63 = vld [vmem:[%s1449_s3 + $0x14] sm:$0xf]  ;;  %v738_v1 = vld [vmem:[%s1449_s3 + $0x18] sm:$0xf0] }
  0x1e   :  { %v801_v0 = vor.u32 %v985_v62, %v800_v61  ;;  %v984_v2 = vld [vmem:[%s1449_s3 + $0x94] sm:$0xf]  ;;  %v802_v3 = vld [vmem:[%s1449_s3 + $0x98] sm:$0xf0]  ;;  %v741_v4 = vor.u32 %v968_v63, %v738_v1  ;;  %v728_v6 = vld [vmem:[%s1449_s3] sm:$0xf] }
  0x1f   :  { %381 = vmatpush.bf16.msra.mxu3 %v809_v31  ;;  %v805_v5 = vor.u32 %v984_v2, %v802_v3  ;;  %v967_v7 = vld [vmem:[%s1449_s3 + $0x4] sm:$0xf0]  ;;  %v792_v8 = vld [vmem:[%s1449_s3 + $0x80] sm:$0xf]  ;;  %v966_v11 = vld [vmem:[%s1449_s3 + $0x4] sm:$0xf] }
  0x20   :  { %140 = vmatpush.bf16.msra.mxu0 %v665_v15  ;;  %v729_v9 = vor.u32 %v967_v7, %v728_v6  ;;  %v983_v10 = vld [vmem:[%s1449_s3 + $0x84] sm:$0xf0]  ;;  %v730_v12 = vld [vmem:[%s1449_s3 + $0x8] sm:$0xf0]  ;;  %v982_v15 = vld [vmem:[%s1449_s3 + $0x84] sm:$0xf] }
  0x21   :  { %153 = vmatpush.bf16.msra.mxu1 %v669_v20  ;;  %369 = vmatpush.bf16.msra.mxu2 %v737_v60  ;;  %v793_v13 = vor.u32 %v983_v10, %v792_v8  ;;  %v733_v14 = vor.u32 %v966_v11, %v730_v12  ;;  %v794_v16 = vld [vmem:[%s1449_s3 + $0x88] sm:$0xf0]  ;;  %v1021_v18 = vld [vmem:[%s1451_s6 + $0x38] sm:$0xff]  ;;  %v1012_v22 = vld [vmem:[%s1452_s5 + $0x70] sm:$0xff] }
  0x22   :  { %v797_v17 = vor.u32 %v982_v15, %v794_v16  ;;  %v1013_v19 = vld [vmem:[%s1452_s5 + $0x78] sm:$0xff]  ;;  %v1004_v23 = vld [vmem:[%s1452_s5 + $0x30] sm:$0xff]  ;;  %v1011_v25 = vld [vmem:[%s1452_s5 + $0x68] sm:$0xff] }
  0x23   :  { %141 = vmatmul.bf16.vlgmr.msra.gmra.mxu0 %v1257_v27  ;;  %382 = vmatpush.bf16.msra.mxu3 %v801_v0  ;;  %v1005_v20 = vld [vmem:[%s1452_s5 + $0x38] sm:$0xff]  ;;  %v1003_v26 = vld [vmem:[%s1452_s5 + $0x28] sm:$0xff]  ;;  %v1018_v28 = vld [vmem:[%s1451_s6 + $0x20] sm:$0xff] }
  0x24   :  { %389 = vmatpush.bf16.msrb.mxu0 %v789_v21  ;;  %154 = vmatmul.bf16.vlgmr.msra.gmra.mxu1 %v1257_v27  ;;  %v1020_v21 = vld [vmem:[%s1451_s6 + $0x30] sm:$0xff]  ;;  %v1010_v29 = vld [vmem:[%s1452_s5 + $0x60] sm:$0xff]  ;;  %v1017_v31 = vld [vmem:[%s1451_s6 + $0x18] sm:$0xff] }
  0x25   :  { %402 = vmatpush.bf16.msrb.mxu1 %v853_v24  ;;  %370 = vmatpush.bf16.msra.mxu2 %v729_v9  ;;  %v1019_v24 = vld [vmem:[%s1451_s6 + $0x28] sm:$0xff]  ;;  %v1002_v30 = vld [vmem:[%s1452_s5 + $0x20] sm:$0xff]  ;;  %v1016_v34 = vld [vmem:[%s1451_s6 + $0x10] sm:$0xff] }
  0x26   :  { %v1008_v49 = vld [vmem:[%s1452_s5 + $0x50] sm:$0xff]  ;;  %v1007_v52 = vld [vmem:[%s1452_s5 + $0x48] sm:$0xff]  ;;  %v1014_v53 = vld [vmem:[%s1451_s6] sm:$0xff] }
  0x27   :  { %383 = vmatpush.bf16.msra.mxu3 %v793_v13  ;;  %v1000_v54 = vld [vmem:[%s1452_s5 + $0x10] sm:$0xff]  ;;  %v1006_v55 = vld [vmem:[%s1452_s5 + $0x40] sm:$0xff] }
  0x28   :  { %390 = vmatpush.bf16.msrb.mxu0 %v781_v32  ;;  %v1009_v32 = vld [vmem:[%s1452_s5 + $0x58] sm:$0xff]  ;;  %v197_v58 = vld [vmem:[%s1454_s4] sm:$0x3] }
  0x29   :  { %403 = vmatpush.bf16.msrb.mxu1 %v845_v33  ;;  %517 = vmatpush.bf16.msrb.mxu2 %v1021_v18  ;;  %v47_v33 = vld [vmem:[%s1453_s2] sm:$0x3]  ;;  %v200_v59 = vperm.slane %v197_v58, 1  ;;  %v199_v0 = vperm.slane %v197_v58, 0 }
  0x2a   :  { %v49_v35 = vperm.slane %v47_v33, 0  ;;  %v50_v36 = vperm.slane %v47_v33, 1 }
  0x2b   :  { %626 = vmatpush.bf16.msrb.mxu3 %v1005_v20  ;;  %v1022_v20 = vld [vmem:[%s1455_s7] ss:$0 sm:$0xff] }
  0x2c   :  { %391 = vmatpush.bf16.msrb.mxu0 %v773_v38 }
  0x2d   :  { %404 = vmatpush.bf16.msrb.mxu1 %v837_v39  ;;  %518 = vmatpush.bf16.msrb.mxu2 %v1020_v21 }
  0x2f   :  { %627 = vmatpush.bf16.msrb.mxu3 %v1004_v23 }
  0x30   :  { %392 = vmatpush.bf16.msrb.mxu0 %v765_v44 }
  0x31   :  { %405 = vmatpush.bf16.msrb.mxu1 %v829_v45  ;;  %519 = vmatpush.bf16.msrb.mxu2 %v1019_v24 }
  0x33   :  { %628 = vmatpush.bf16.msrb.mxu3 %v1003_v26 }
  0x34   :  { %393 = vmatpush.bf16.msrb.mxu0 %v757_v50  ;;  %v1015_v50 = vld [vmem:[%s1451_s6 + $0x8] sm:$0xff] }
  0x35   :  { %406 = vmatpush.bf16.msrb.mxu1 %v821_v51  ;;  %520 = vmatpush.bf16.msrb.mxu2 %v1018_v28  ;;  %v1001_v51 = vld [vmem:[%s1452_s5 + $0x18] sm:$0xff] }
  0x37   :  { %629 = vmatpush.bf16.msrb.mxu3 %v1002_v30 }
  0x38   :  { %394 = vmatpush.bf16.msrb.mxu0 %v749_v56  ;;  %v999_v56 = vld [vmem:[%s1452_s5 + $0x8] sm:$0xff] }
  0x39   :  { %407 = vmatpush.bf16.msrb.mxu1 %v813_v57  ;;  %521 = vmatpush.bf16.msrb.mxu2 %v1017_v31  ;;  %v998_v57 = vld [vmem:[%s1452_s5] sm:$0xff] }
  0x3b   :  { %630 = vmatpush.bf16.msrb.mxu3 %v1001_v51 }
  0x3c   :  { %395 = vmatpush.bf16.msrb.mxu0 %v741_v4 }
  0x3d   :  { %408 = vmatpush.bf16.msrb.mxu1 %v805_v5  ;;  %522 = vmatpush.bf16.msrb.mxu2 %v1016_v34 }
  0x3f   :  { %631 = vmatpush.bf16.msrb.mxu3 %v1000_v54 }
  0x40   :  { %396 = vmatpush.bf16.msrb.mxu0 %v733_v14 }
  0x41   :  { %409 = vmatpush.bf16.msrb.mxu1 %v797_v17  ;;  %523 = vmatpush.bf16.msrb.mxu2 %v1015_v50 }
  0x43   :  { %632 = vmatpush.bf16.msrb.mxu3 %v999_v56 }
  0x44   :  { %639 = vmatpush.bf16.msra.mxu0 %v1013_v19 }
  0x45   :  { %524 = vmatpush.bf16.msrb.mxu2 %v1014_v53 }
  0x47   :  { %633 = vmatpush.bf16.msrb.mxu3 %v998_v57 }
  0x48   :  { %640 = vmatpush.bf16.msra.mxu0 %v1012_v22 }
  0x4c   :  { %641 = vmatpush.bf16.msra.mxu0 %v1011_v25 }
  0x50   :  { %642 = vmatpush.bf16.msra.mxu0 %v1010_v29 }
  0x54   :  { %643 = vmatpush.bf16.msra.mxu0 %v1009_v32 }
  0x58   :  { %644 = vmatpush.bf16.msra.mxu0 %v1008_v49 }
  0x5c   :  { %645 = vmatpush.bf16.msra.mxu0 %v1007_v52 }
  0x60   :  { %646 = vmatpush.bf16.msra.mxu0 %v1006_v55 }
  0xa0   :  { %v142_v37 = vpop.f32.mrf.mxu0 }
  0xa1   :  { %v143_v38 = vadd.f32 %v142_v37, %v49_v35  ;;  %v155_v39 = vpop.f32.mrf.mxu1 }
  0xa2   :  { %v156_v40 = vadd.f32 %v155_v39, %v50_v36 }
  0xa3   :  { %v159_v41 = vmul.f32 0.1, %v143_v38 }
  0xa4   :  { %v160_v42 = vmul.f32 0.1, %v156_v40 }
  0xa5   :  { %v161_v43 = vmax.f32 %v143_v38, %v159_v41 }
  0xa6   :  { %v162_v44 = vmax.f32 %v156_v40, %v160_v42 }
  0xa7   :  { %v163_v45 = vpack.c.bf16 %v161_v43, %v161_v43 }
  0xa8   :  { %v144_v46 = vpop.f32.mrf.mxu0  ;;  %v164_v47 = vpack.c.bf16 %v162_v44, %v162_v44 }
  0xa9   :  { %v157_v48 = vpop.f32.mrf.mxu1  ;;  %371 = vmatmul.bf16.vlgmr.msra.gmra.mxu2 %v163_v45  ;;  %397 = vmatmul.bf16.vlgmr.msrb.gmra.mxu0 %v163_v45 }
  0xaa   :  { %384 = vmatmul.bf16.vlgmr.msra.gmra.mxu3 %v164_v47  ;;  %410 = vmatmul.bf16.vlgmr.msrb.gmra.mxu1 %v164_v47 }
  0xb9   :  { %525 = vmatmul.bf16.vlgmr.msrb.gmra.mxu2 %v1257_v27 }
 0x126   :  { %v398_v60 = vpop.f32.mrf.mxu0 }
 0x127   :  { %v399_v61 = vadd.f32 %v398_v60, %v200_v59  ;;  %v411_v62 = vpop.f32.mrf.mxu1 }
 0x129   :  { %v412_v63 = vadd.f32 %v411_v62, %v399_v61 }
 0x12b   :  { %v416_v1 = vmul.f32 0.1, %v412_v63 }
 0x12c   :  { %v372_v2 = vpop.f32.mrf.mxu2 }
 0x12d   :  { %v418_v3 = vmax.f32 %v412_v63, %v416_v1  ;;  %v373_v27 = vadd.f32 %v372_v2, %v199_v0  ;;  %v385_v4 = vpop.f32.mrf.mxu3 }
 0x12e   :  { %v400_v5 = vpop.f32.mrf.mxu0 }
 0x12f   :  { %v420_v6 = vpack.c.bf16 %v418_v3, %v418_v3  ;;  %v386_v7 = vadd.f32 %v385_v4, %v373_v27  ;;  %v413_v8 = vpop.f32.mrf.mxu1 }
 0x131   :  { %v415_v9 = vmul.f32 0.1, %v386_v7  ;;  %647 = vmatmul.bf16.vlgmr.msra.gmra.mxu0 %v420_v6 }
 0x133   :  { %v417_v10 = vmax.f32 %v386_v7, %v415_v9 }
 0x134   :  { %v374_v11 = vpop.f32.mrf.mxu2 }
 0x135   :  { %v419_v12 = vpack.c.bf16 %v417_v10, %v417_v10  ;;  %v387_v13 = vpop.f32.mrf.mxu3 }
 0x137   :  { %634 = vmatmul.bf16.vlgmr.msrb.gmra.mxu3 %v419_v12 }
 0x13c   :  { %v526_v14 = vpop.f32.mrf.mxu2 }
 0x144   :  { %v528_v15 = vpop.f32.mrf.mxu2 }
 0x1ae   :  { %v648_v16 = vpop.f32.mrf.mxu0 }
 0x1b6   :  { %v650_v17 = vpop.f32.mrf.mxu0 }
 0x1ba   :  { %v635_v18 = vpop.f32.mrf.mxu3 }
 0x1bb   :  { %v636_v19 = vadd.f32 %v635_v18, %v526_v14 }
 0x1bd   :  { %v649_v21 = vadd.f32 %v648_v16, %v636_v19 }
 0x1bf   :  { %v656_v22 = vadd.f32 %v1022_v20, %v649_v21 }
 0x1c1   :  { %657 = vst [vmem:[%s1456_s8] sm:$0xf] %v656_v22 }
 0x1c2   :  { %v637_v23 = vpop.f32.mrf.mxu3 }

</bundles_post_ra>
